<compile_context>
chip_gen: v5e
topology: v5e:2x2
jax: 0.10.0
libtpu: 0.0.40
codegen_flags: <defaults>
</compile_context>

<pallas_src>
import functools

import jax
import jax.numpy as jnp
from jax import lax
from jax.experimental import pallas as pl
from jax.experimental.pallas import tpu as pltpu


def _round_up(x, m):
    return (x + m - 1) // m * m


def _se_kernel(x_ref, w1_ref, b1_ref, w2_ref, b2_ref, o_ref, acc_ref,
               *, total_s, chunk, ragged, inv_s, with_sigmoid):
    k = pl.program_id(1)

    @pl.when(k == 0)
    def _init():
        acc_ref[...] = jnp.zeros_like(acc_ref)

    n128 = chunk // 128                                   # static
    if ragged:
        # one vreg row; broadcasts across C inside the select
        lane = lax.broadcasted_iota(jnp.int32, (1, 1, 128), 2)

    # ---- per-chunk partial sum ---------------------------------------------
    # Fold 128-lane groups straight into the VMEM accumulator.  Per group:
    # one lane-aligned load, optional mask, one VMEM add -- bounded register
    # pressure, and the whole fold hides under the HBM DMA of the next chunk.
    @pl.loop(0, n128)
    def _fold(j):
        off = pl.multiple_of(j * 128, 128)
        xs = x_ref[:, :, pl.ds(off, 128)].astype(jnp.float32)   # (1, C, 128)
        if ragged:
            rem = total_s - k * chunk - off            # valid lanes this group
            xs = jnp.where(lane < rem, xs, 0.0)        # zero the OOB tail lanes
        acc_ref[...] += xs

    # ---- epilogue: mean + FC1 + ReLU + FC2 (+ sigmoid), last chunk only -----
    @pl.when(k == pl.num_programs(1) - 1)
    def _finalize():
        y = jnp.sum(acc_ref[...], axis=-1) * inv_s     # (1, C) global mean
        h = jnp.dot(y, w1_ref[...],
                    preferred_element_type=jnp.float32) + b1_ref[...]
        h = jnp.maximum(h, 0.0)
        z = jnp.dot(h, w2_ref[...],
                    preferred_element_type=jnp.float32) + b2_ref[...]
        if with_sigmoid:
            z = jax.nn.sigmoid(z)
        o_ref[...] = z[:, None, :]                     # (1, 1, C)


def se_layer(x, w1, b1, w2, b2, *, with_sigmoid=True,
             vmem_limit_bytes=None, max_chunk_lanes=None):
    """SELayer forward. x: (B, C, D, H, W). Returns (B, C, 1, 1, 1) float32."""
    B, C, D, H, W = x.shape
    S = D * H * W
    Hdim = w1.shape[0]
    itemsize = jnp.dtype(x.dtype).itemsize

    # ---- generation-aware VMEM budget (v7x 64 MiB, v5e/v6e 128 MiB) ---------
    if vmem_limit_bytes is None:
        try:
            cap = int(pltpu.get_tpu_info().vmem_capacity_bytes)
        except Exception:
            cap = 64 * 1024 * 1024                     # conservative (v7x-sized)
        # ~48 MiB on v7x, ~96-100 MiB on v5e/v6e
        vmem_limit_bytes = min((cap * 3) // 4, 100 * 1024 * 1024)
    vmem_limit_bytes = int(vmem_limit_bytes)

    # Resident VMEM: weights/biases (double-buffered by BlockSpec), the f32
    # accumulator scratch, and the double-buffered (1,1,C) output block.
    resident = (2 * (2 * C * Hdim + Hdim + C) * 4
                + C * 128 * 4
                + 2 * C * 4)
    budget = max(vmem_limit_bytes - resident - 2 * 1024 * 1024,
                 vmem_limit_bytes // 4)
    # x blocks are double-buffered -> explicit 2x multiplier here.
    chunk_cap = max(128, (budget // (2 * C * itemsize)) // 128 * 128)
    if max_chunk_lanes is not None:                    # test / tuning hook
        chunk_cap = min(chunk_cap, max(128, (max_chunk_lanes // 128) * 128))
    chunk = min(_round_up(S, 128), chunk_cap)
    num_chunks = pl.cdiv(S, chunk)
    ragged = (S % chunk) != 0

    # No jnp.pad: ragged tails are masked in-kernel, so x is touched by
    # exactly one HBM pass.
    x_flat = x.reshape(B, C, S)

    # Pre-transpose PyTorch Linear weights (out,in)->(in,out); biases -> (1,out).
    w1_t = jnp.transpose(w1).astype(jnp.float32)       # (C, Hdim)
    w2_t = jnp.transpose(w2).astype(jnp.float32)       # (Hdim, C)
    b1_r = b1.reshape(1, -1).astype(jnp.float32)       # (1, Hdim)
    b2_r = b2.reshape(1, -1).astype(jnp.float32)       # (1, C)

    kernel = functools.partial(
        _se_kernel, total_s=S, chunk=chunk, ragged=ragged,
        inv_s=1.0 / float(S), with_sigmoid=with_sigmoid)

    cost = pl.CostEstimate(
        flops=int(B * C * S + 4 * B * C * Hdim),
        transcendentals=int(B * C) if with_sigmoid else 0,
        bytes_accessed=int(B * C * S * itemsize
                           + 2 * C * Hdim * 4 + (C + Hdim) * 4 + B * C * 4),
    )

    out = pl.pallas_call(
        kernel,
        out_shape=jax.ShapeDtypeStruct((B, 1, C), jnp.float32),
        grid_spec=pltpu.PrefetchScalarGridSpec(
            num_scalar_prefetch=0,
            grid=(B, num_chunks),
            in_specs=[
                # x: one batch row, all channels, one S chunk per grid step
                pl.BlockSpec((1, C, chunk), lambda b, k: (b, 0, k)),
                # weights / biases: constant index maps -> resident in VMEM
                pl.BlockSpec((C, Hdim), lambda b, k: (0, 0)),
                pl.BlockSpec((1, Hdim), lambda b, k: (0, 0)),
                pl.BlockSpec((Hdim, C), lambda b, k: (0, 0)),
                pl.BlockSpec((1, C), lambda b, k: (0, 0)),
            ],
            out_specs=pl.BlockSpec((1, 1, C), lambda b, k: (b, 0, 0)),
            scratch_shapes=[pltpu.VMEM((1, C, 128), jnp.float32)],
        ),
        # TODO(synk): for B == 1 on v7x (2 TensorCores) additionally split the
        # S axis across cores (parallel split + per-core partial accumulators
        # + merge) so the second core is not idle; with B >= 2 the parallel
        # batch axis already feeds both cores.
        compiler_params=pltpu.CompilerParams(
            dimension_semantics=("parallel", "arbitrary"),
            vmem_limit_bytes=vmem_limit_bytes,
        ),
        cost_estimate=cost,
    )(x_flat, w1_t, b1_r, w2_t, b2_r)

    return out.reshape(B, C, 1, 1, 1)


def _reference(x, w1, b1, w2, b2, with_sigmoid=True):
    B, C = x.shape[:2]
    y = jnp.mean(x.astype(jnp.float32), axis=(2, 3, 4))  # (B, C)
    h = jnp.maximum(y @ w1.T + b1, 0.0)                  # (B, C//r)
    z = h @ w2.T + b2                                    # (B, C)
    if with_sigmoid:
        z = jax.nn.sigmoid(z)
    return z.reshape(B, C, 1, 1, 1)


if __name__ == "__main__":
    key = jax.random.PRNGKey(0)

    # small shapes consistent with the module (channel=32, reduction=16)
    B, C, D, H, W = 2, 32, 4, 8, 8
    reduction = 16
    Hdim = C // reduction

    k_x, k_w1, k_b1, k_w2, k_b2, k_x2, k_x3 = jax.random.split(key, 7)
    x = jax.random.normal(k_x, (B, C, D, H, W), dtype=jnp.float32)
    # nn.Linear layout: weight (out, in), bias (out,)
    w1 = jax.random.normal(k_w1, (Hdim, C), dtype=jnp.float32) * 0.1
    b1 = jax.random.normal(k_b1, (Hdim,), dtype=jnp.float32) * 0.1
    w2 = jax.random.normal(k_w2, (C, Hdim), dtype=jnp.float32) * 0.1
    b2 = jax.random.normal(k_b2, (C,), dtype=jnp.float32) * 0.1

    # single-chunk, S multiple of 128
    out = jax.block_until_ready(se_layer(x, w1, b1, w2, b2))
    ref = _reference(x, w1, b1, w2, b2)
    assert out.shape == (B, C, 1, 1, 1)
    assert jnp.allclose(out, ref, atol=1e-5, rtol=1e-5)

    # forced multi-chunk: exercises cross-chunk accumulation + init/finalize
    out_mc = jax.block_until_ready(
        se_layer(x, w1, b1, w2, b2, max_chunk_lanes=128))
    assert jnp.allclose(out_mc, ref, atol=1e-5, rtol=1e-5)

    # ragged spatial size (S = 105 < 128): in-kernel tail mask, no jnp.pad
    x2 = jax.random.normal(k_x2, (B, C, 3, 5, 7), dtype=jnp.float32)
    out2 = jax.block_until_ready(se_layer(x2, w1, b1, w2, b2))
    ref2 = _reference(x2, w1, b1, w2, b2)
    assert jnp.allclose(out2, ref2, atol=1e-5, rtol=1e-5)

    # ragged AND multi-chunk (S = 195, chunk = 128 -> partial 2nd chunk)
    x3 = jax.random.normal(k_x3, (B, C, 3, 5, 13), dtype=jnp.float32)
    out3 = jax.block_until_ready(
        se_layer(x3, w1, b1, w2, b2, max_chunk_lanes=128))
    ref3 = _reference(x3, w1, b1, w2, b2)
    assert jnp.allclose(out3, ref3, atol=1e-5, rtol=1e-5)

    # bf16 activations streamed as-is (f32 accumulation happens in-kernel)
    x_bf16 = x.astype(jnp.bfloat16)
    out_bf = jax.block_until_ready(se_layer(x_bf16, w1, b1, w2, b2))
    ref_bf = _reference(x_bf16, w1, b1, w2, b2)
    assert jnp.allclose(out_bf, ref_bf, atol=1e-4, rtol=1e-4)

    # with_sigmoid=False branch
    out_ns = jax.block_until_ready(
        se_layer(x, w1, b1, w2, b2, with_sigmoid=False))
    ref_ns = _reference(x, w1, b1, w2, b2, with_sigmoid=False)
    assert jnp.allclose(out_ns, ref_ns, atol=1e-5, rtol=1e-5)

    print("KERNEL_OK")
</pallas_src>

<mosaic_0001>
module attributes {stable_mosaic.version = 11 : i64} {
  func.func @_se_kernel(%arg0: i32, %arg1: i32, %arg2: memref<1x32x256xf32, #tpu.memory_space<vmem>>, %arg3: memref<32x2xf32, #tpu.memory_space<vmem>>, %arg4: memref<1x2xf32, #tpu.memory_space<vmem>>, %arg5: memref<2x32xf32, #tpu.memory_space<vmem>>, %arg6: memref<1x32xf32, #tpu.memory_space<vmem>>, %arg7: memref<1x1x32xf32, #tpu.memory_space<vmem>>, %arg8: memref<1x32x128xf32, #tpu.memory_space<vmem>>) attributes {dimension_semantics = [#tpu.dimension_semantics<parallel>, #tpu.dimension_semantics<arbitrary>], iteration_bounds = array<i64: 2, 1>, scalar_prefetch = 0 : i64, scratch_operands = 1 : i64, tpu.core_type = #tpu.core_type<tc>, window_params = [{transform_indices = @transform_0, window_bounds = array<i64: 1, 32, 256>}, {pipeline_mode = #tpu.pipeline_mode<synchronous>, transform_indices = @transform_1, window_bounds = array<i64: 32, 2>}, {pipeline_mode = #tpu.pipeline_mode<synchronous>, transform_indices = @transform_2, window_bounds = array<i64: 1, 2>}, {pipeline_mode = #tpu.pipeline_mode<synchronous>, transform_indices = @transform_3, window_bounds = array<i64: 2, 32>}, {pipeline_mode = #tpu.pipeline_mode<synchronous>, transform_indices = @transform_4, window_bounds = array<i64: 1, 32>}, {transform_indices = @transform_5, window_bounds = array<i64: 1, 1, 32>}]} {
    %c0_i32 = arith.constant 0 : i32
    %0 = arith.cmpi eq, %arg1, %c0_i32 : i32
    %1 = arith.extui %0 : i1 to i32
    %c0_i32_0 = arith.constant 0 : i32
    %2 = arith.cmpi ne, %1, %c0_i32_0 : i32
    scf.if %2 {
      %cst = arith.constant 0.000000e+00 : f32
      %7 = vector.broadcast %cst : f32 to vector<1x32x128xf32>
      %c0 = arith.constant 0 : index
      %c0_5 = arith.constant 0 : index
      %c0_6 = arith.constant 0 : index
      %8 = vector.load %arg8[%c0, %c0_5, %c0_6] : memref<1x32x128xf32, #tpu.memory_space<vmem>>, vector<1x32x128xf32>
      tpu.vector_store %arg8[%c0, %c0_5, %c0_6], %7 {strides = array<i32>} : memref<1x32x128xf32, #tpu.memory_space<vmem>>, vector<1x32x128xf32>,
    } else {
    }
    %c0_i32_1 = arith.constant 0 : i32
    %c2_i32 = arith.constant 2 : i32
    %3 = arith.addi %c0_i32_1, %c2_i32 : i32
    %c1_i32 = arith.constant 1 : i32
    scf.for %arg9 = %c0_i32_1 to %3 step %c1_i32  : i32 {
      %c1_i32_5 = arith.constant 1 : i32
      %7 = arith.muli %arg9, %c1_i32_5 : i32
      %c0_i32_6 = arith.constant 0 : i32
      %8 = arith.addi %c0_i32_6, %7 : i32
      %c128_i32 = arith.constant 128 : i32
      %9 = arith.muli %8, %c128_i32 : i32
      %10 = tpu.assume_multiple %9, 128 : i32
      %c0 = arith.constant 0 : index
      %c0_7 = arith.constant 0 : index
      %11 = arith.index_cast %10 : i32 to index
      %12 = vector.load %arg2[%c0, %c0_7, %11] : memref<1x32x256xf32, #tpu.memory_space<vmem>>, vector<1x32x128xf32>
      %c0_8 = arith.constant 0 : index
      %c0_9 = arith.constant 0 : index
      %c0_10 = arith.constant 0 : index
      %13 = vector.load %arg8[%c0_8, %c0_9, %c0_10] : memref<1x32x128xf32, #tpu.memory_space<vmem>>, vector<1x32x128xf32>
      %14 = arith.addf %13, %12 : vector<1x32x128xf32>
      %c0_11 = arith.constant 0 : index
      %c0_12 = arith.constant 0 : index
      %c0_13 = arith.constant 0 : index
      %15 = vector.load %arg8[%c0_11, %c0_12, %c0_13] : memref<1x32x128xf32, #tpu.memory_space<vmem>>, vector<1x32x128xf32>
      tpu.vector_store %arg8[%c0_11, %c0_12, %c0_13], %14 {strides = array<i32>} : memref<1x32x128xf32, #tpu.memory_space<vmem>>, vector<1x32x128xf32>,
    }
    %c2_i32_2 = arith.constant 2 : i32
    %c0_i32_3 = arith.constant 0 : i32
    %4 = arith.cmpi eq, %arg1, %c0_i32_3 : i32
    %5 = arith.extui %4 : i1 to i32
    %c0_i32_4 = arith.constant 0 : i32
    %6 = arith.cmpi ne, %5, %c0_i32_4 : i32
    scf.if %6 {
      %c0 = arith.constant 0 : index
      %c0_5 = arith.constant 0 : index
      %c0_6 = arith.constant 0 : index
      %7 = vector.load %arg8[%c0, %c0_5, %c0_6] : memref<1x32x128xf32, #tpu.memory_space<vmem>>, vector<1x32x128xf32>
      %cst = arith.constant dense<0.000000e+00> : vector<1x32xf32>
      %8 = vector.multi_reduction <add>, %7, %cst [2] : vector<1x32x128xf32> to vector<1x32xf32>
      %cst_7 = arith.constant 3.906250e-03 : f32
      %9 = vector.broadcast %cst_7 : f32 to vector<1x32xf32>
      %10 = arith.mulf %8, %9 : vector<1x32xf32>
      %c0_8 = arith.constant 0 : index
      %c0_9 = arith.constant 0 : index
      %11 = vector.load %arg3[%c0_8, %c0_9] : memref<32x2xf32, #tpu.memory_space<vmem>>, vector<32x2xf32>
      %cst_10 = arith.constant dense<0.000000e+00> : vector<1x2xf32>
      %12 = tpu.matmul %10, %11, %cst_10 {dimension_numbers = #tpu.dot_dimension_numbers<[1], [0], [0], [1], [0, 0, 1, 1], [], []>} : vector<1x32xf32>, vector<32x2xf32>, vector<1x2xf32> -> vector<1x2xf32>
      %c0_11 = arith.constant 0 : index
      %c0_12 = arith.constant 0 : index
      %13 = vector.load %arg4[%c0_11, %c0_12] : memref<1x2xf32, #tpu.memory_space<vmem>>, vector<1x2xf32>
      %14 = arith.addf %12, %13 : vector<1x2xf32>
      %cst_13 = arith.constant 0.000000e+00 : f32
      %15 = vector.broadcast %cst_13 : f32 to vector<1x2xf32>
      %16 = arith.maximumf %14, %15 : vector<1x2xf32>
      %c0_14 = arith.constant 0 : index
      %c0_15 = arith.constant 0 : index
      %17 = vector.load %arg5[%c0_14, %c0_15] : memref<2x32xf32, #tpu.memory_space<vmem>>, vector<2x32xf32>
      %cst_16 = arith.constant dense<0.000000e+00> : vector<1x32xf32>
      %18 = tpu.matmul %16, %17, %cst_16 {dimension_numbers = #tpu.dot_dimension_numbers<[1], [0], [0], [1], [0, 0, 1, 1], [], []>} : vector<1x2xf32>, vector<2x32xf32>, vector<1x32xf32> -> vector<1x32xf32>
      %c0_17 = arith.constant 0 : index
      %c0_18 = arith.constant 0 : index
      %19 = vector.load %arg6[%c0_17, %c0_18] : memref<1x32xf32, #tpu.memory_space<vmem>>, vector<1x32xf32>
      %20 = arith.addf %18, %19 : vector<1x32xf32>
      %21 = arith.negf %20 : vector<1x32xf32>
      %22 = math.exp %21 : vector<1x32xf32>
      %cst_19 = arith.constant 1.000000e+00 : f32
      %23 = vector.broadcast %cst_19 : f32 to vector<1x32xf32>
      %24 = arith.addf %23, %22 : vector<1x32xf32>
      %25 = arith.divf %23, %24 : vector<1x32xf32>
      %26 = vector.shape_cast %25 : vector<1x32xf32> to vector<1x1x32xf32>
      %c0_20 = arith.constant 0 : index
      %c0_21 = arith.constant 0 : index
      %c0_22 = arith.constant 0 : index
      %27 = vector.load %arg7[%c0_20, %c0_21, %c0_22] : memref<1x1x32xf32, #tpu.memory_space<vmem>>, vector<1x1x32xf32>
      tpu.vector_store %arg7[%c0_20, %c0_21, %c0_22], %26 {strides = array<i32>} : memref<1x1x32xf32, #tpu.memory_space<vmem>>, vector<1x1x32xf32>,
    } else {
    }
    return
  }
  func.func @transform_0(%arg0: i32, %arg1: i32) -> (i32, i32, i32) {
    %c0_i32 = arith.constant 0 : i32
    %c0_i32_0 = arith.constant 0 : i32
    return %arg0, %c0_i32, %arg1 : i32, i32, i32
  }
  func.func @transform_1(%arg0: i32, %arg1: i32) -> (i32, i32) {
    %c0_i32 = arith.constant 0 : i32
    %c0_i32_0 = arith.constant 0 : i32
    %c0_i32_1 = arith.constant 0 : i32
    return %c0_i32, %c0_i32_0 : i32, i32
  }
  func.func @transform_2(%arg0: i32, %arg1: i32) -> (i32, i32) {
    %c0_i32 = arith.constant 0 : i32
    %c0_i32_0 = arith.constant 0 : i32
    %c0_i32_1 = arith.constant 0 : i32
    return %c0_i32, %c0_i32_0 : i32, i32
  }
  func.func @transform_3(%arg0: i32, %arg1: i32) -> (i32, i32) {
    %c0_i32 = arith.constant 0 : i32
    %c0_i32_0 = arith.constant 0 : i32
    %c0_i32_1 = arith.constant 0 : i32
    return %c0_i32, %c0_i32_0 : i32, i32
  }
  func.func @transform_4(%arg0: i32, %arg1: i32) -> (i32, i32) {
    %c0_i32 = arith.constant 0 : i32
    %c0_i32_0 = arith.constant 0 : i32
    %c0_i32_1 = arith.constant 0 : i32
    return %c0_i32, %c0_i32_0 : i32, i32
  }
  func.func @transform_5(%arg0: i32, %arg1: i32) -> (i32, i32, i32) {
    %c0_i32 = arith.constant 0 : i32
    %c0_i32_0 = arith.constant 0 : i32
    %c0_i32_1 = arith.constant 0 : i32
    return %arg0, %c0_i32, %c0_i32_0 : i32, i32, i32
  }
}

</mosaic_0001>

<bundles_post_ra>
// kernel: tpu_custom_call.1
= control target key start
LH: loop header
LB: loop body
LE: loop exit
PB: predicated region body
PF: predicated region fallthrough
CT: control target
= control target key end

     0   :  { %10 = vsyncpa [#allocation4], 0  ;;  %s910_s0 = inlined_call_operand.hbm [shape: f32[2,32,256], index: 0, kind: input, shape index: {}]   ;;  %s911_s1 = inlined_call_operand.vmem [shape: f32[32,2], index: 1, kind: input, shape index: {}]   ;;  %s912_s2 = inlined_call_operand.vmem [shape: f32[1,2], index: 2, kind: input, shape index: {}]   ;;  %s913_s3 = inlined_call_operand.vmem [shape: f32[2,32], index: 3, kind: input, shape index: {}]   ;;  %s914_s4 = inlined_call_operand.vmem [shape: f32[1,32], index: 4, kind: input, shape index: {}]   ;;  %s915_s5 = inlined_call_operand.hbm [shape: f32[2,1,32], index: 5, kind: output, shape index: {}]  }
   0x1   :  { %12 = vsyncpa [#allocation4 + $0x1], 0 }
   0x2   :  { %13 = vsyncpa [#allocation5], 0 }
   0x3   :  { %15 = vsyncpa [#allocation5 + $0x1], 0  ;;  %s761_s18 = smov 0   ;;  %s763_s19 = smov 0  }
   0x4   :  { %s765_s20 = smov 0   ;;  %s767_s21 = smov 0  }
   0x5   :  { %s769_s22 = smov 0   ;;  %s771_s23 = smov 0  }
   0x6 LB: > { %s511_s24 = sadd.s32 4294967295, %s722_s23   ;;  %s512_s25 = sadd.s32 4294967294, %s722_s23   ;;  %s722_s23 = sphi %s771_s23, %s21_s23   ;;  %s718_s22 = sphi %s769_s22, %s924_s22   ;;  %s714_s21 = sphi %s767_s21, %s923_s21   ;;  %s710_s20 = sphi %s765_s20, %s922_s20   ;;  %s706_s19 = sphi %s763_s19, %s921_s19   ;;  %s702_s18 = sphi %s761_s18, %s920_s18  }
   0x7   : > { %s33_s26 = sadd.s32 1, %s718_s22  ;;  %s42_s27 = sadd.s32 1, %s710_s20 }
   0x8   : > { %p35_p0 = scmp.ge.s32.totalorder %s33_s26, 2  ;;  %p49_p1 = scmp.ne.s32.totalorder %s710_s20, %s706_s19 }
   0x9   : > { %p50_p2 = scmp.eq.s32.totalorder %s722_s23, 0  ;;  %p55_p3 = scmp.ne.s32.totalorder %s706_s19, %s702_s18 }
   0xa   : > { %s926_s26 = smov (%p35_p0, %s33_s26), 0  ;;  %p56_p5 = scmp.eq.s32.totalorder %s511_s24, 0 }
   0xb   : > { %p802_p4 = por %p50_p2, %p49_p1  ;;  %s37_s29 = ssub.s32 %s718_s22, %s926_s26 }
   0xc   : > { %p163_p6 = scmp.eq.s32.totalorder %s511_s24, 1  ;;  %p40_p7 = scmp.eq.s32.totalorder %s37_s29, 0 }
   0xd   : > { %p808_p8 = por %p56_p5, %p55_p3  ;;  %p169_p10 = scmp.eq.s32.totalorder %s512_s25, 1 }
   0xe   : > { %p812_p9 = por %p163_p6, %p49_p1  ;;  %p514_p12 = scmp.ge.s32.totalorder %s722_s23, 2 }
   0xf   : > { %s817_s7 = scalar_select %p40_p7, %s710_s20, %s42_s27  }
  0x10   : > { %p819_p11 = por %p169_p10, %p55_p3  ;;  %p541_p13 = scmp.lt.s32.totalorder %s722_s23, 2 }
  0x11   : > { %s201_s9 = sand.u32 1, %s710_s20   ;;  %s528_s11 = sshll.u32 %s718_s22, 6 }
  0x12   : > { %s515_s10 = sshll.u32 %s201_s9, 6  ;;  %s212_s14 = scalar_lea.hbm %s910_s0, %s528_s11 }
  0x13   : > { %s205_s15 = scalar_lea.vmem [#allocation3], %s515_s10  ;;  %s213_s17 = sshll.u32 %s212_s14, 4  ;;  %s214_s17 = int_to_ptr.hbm [resolvable:$true] %s213_s17 }
  0x14   : > { %s215_s16 = sshll.u32 %s205_s15, 4  ;;  %p534_p0 = pnand %p541_p13, %p802_p4  ;;  %s216_s16 = int_to_ptr.vmem [resolvable:$true] %s215_s16 }
  0x15   : > { %p518_p1 = scmp.ge.s32.totalorder %s722_s23, 1  ;;  %s202_s24 = scalar_lea.sflag [#allocation4], %s201_s9 }
  0x16   : > { %s728_s25 = smov 256   ;;  %s729_s27 = smov 16  }
  0x17   : > { %536 = dma.hbm_to_vmem [thread:$0]  (!%p534_p0), %s214_s17, 1024, %s216_s16, %s202_s24, %s728_s25, %s728_s25, %s729_s27  }
  0x18   : > { %p223_p2 = scmp.lt.s32.totalorder %s722_s23, 3 }
  0x1a   : > { %p224_p3 = pnand %p518_p1, %p223_p2 }
  0x1b   : > { %s835_s29 = sand.u32 (!%p224_p3), 1, %s706_s19  }
  0x1c   : > { %227 = sbr.rel (%p224_p3) target bundleno = 475 (0x1db), region = 40  ;;  %s519_s10 = sshll.u32 (!%p224_p3), %s835_s29, 6 }
  0x1d   : > { %s230_s11 = scalar_lea.sflag (!%p224_p3), [#allocation4], %s835_s29  ;;  %s839_s12 = scalar_lea.vmem (!%p224_p3), [#allocation3], %s519_s10 }
  0x21   : > { %693 = dma.done.wait (%p808_p8), %s230_s11, 1024  }
  0x22   : > { %695 = vsyncadd (%p808_p8), %s230_s11, 4294966272  ;;  %v730_v0 = vmov 0.0   ;;  %s259_s28 = scalar_lea.vmem [#allocation6], %s835_s29  ;;  %s724_s9 = smov 0  }
  0x23   : > { %265 = vst [vmem:[#allocation2 + $0x10] sm:$0xff] %v730_v0 }
  0x24   : > { %266 = vst [vmem:[#allocation2] sm:$0xff] %v730_v0 }
  0x25   : > { %267 = vst [vmem:[#allocation2 + $0x18] sm:$0xff] %v730_v0 }
  0x26   : > { %268 = vst [vmem:[#allocation2 + $0x8] sm:$0xff] %v730_v0 }
  0x27 LB: >> { %s520_s13 = sshll.u32 %s726_s9, 7  ;;  %s274_s9 = sadd.s32 1, %s726_s9   ;;  %s726_s9 = sphi %s724_s9, %s274_s9  }
  0x28   : >> { %s276_s14 = sshra.s32 %s520_s13, 7  ;;  %p271_p4 = scmp.ge.s32.totalorder %s274_s9, 2  }
  0x29   : >> { %s521_s15 = sshll.u32 %s276_s14, 3  ;;  %v318_v17 = vld [vmem:[%s911_s1 + $0x18] sm:$0xff] (%p271_p4)  ;;  %v317_v18 = vld [vmem:[%s911_s1 + $0x10] sm:$0xff] (%p271_p4)  ;;  %v316_v19 = vld [vmem:[%s911_s1 + $0x8] sm:$0xff] (%p271_p4)  ;;  %v324_v21 = vlaneseq (%p271_p4)  ;;  %vm329_vm0 = vcmask (%p271_p4), 130112   ;;  %vm333_vm1 = vcmask (%p271_p4), 195712   ;;  %s423_s25 = scalar_lea.hbm (%p271_p4), %s915_s5, %s714_s21 }
  0x2a   : >> { %v284_v1 = vld [vmem:[#allocation2 + $0x10] sm:$0xff]  ;;  %s279_s30 = scalar_lea.vmem %s839_s12, %s521_s15 [#allocation3]  ;;  %354 = vmatpush.msra.mxu0 (%p271_p4), %v318_v17  ;;  %v315_v20 = vld [vmem:[%s911_s1] sm:$0xff] (%p271_p4)  ;;  %vm337_vm2 = vcmask (%p271_p4), 261312   ;;  %vm339_vm3 = vcmask (%p271_p4), 261120   ;;  %vm369_vm4 = vcmask (%p271_p4), 1041408   ;;  %vm365_vm5 = vcmask (%p271_p4), 15360  }
  0x2b   : >> { %v285_v2 = vld [vmem:[#allocation2] sm:$0xff]  ;;  %v281_v6 = vld [vmem:[%s279_s30 + $0x10] sm:$0xff]  ;;  %v325_v24 = vand.u32 (%p271_p4), 127, %v324_v21  ;;  %s425_s27 = sshll.u32 (%p271_p4), %s259_s28, 4  ;;  %s427_s10 = sshll.u32 (%p271_p4), %s423_s25, 4  ;;  %vm412_vm9 = vcmask (%p271_p4), 253952   ;;  %s426_s27 = int_to_ptr.vmem [resolvable:$true] %s425_s27  ;;  %s428_s10 = int_to_ptr.hbm [resolvable:$true] %s427_s10 }
  0x2c   : >> { %v286_v3 = vld [vmem:[#allocation2 + $0x18] sm:$0xff]  ;;  %v280_v5 = vld [vmem:[%s279_s30] sm:$0xff]  ;;  %v289_v9 = vadd.f32 %v285_v2, %v281_v6  ;;  %v283_v11 = vld [vmem:[%s279_s30 + $0x30] sm:$0xff]  ;;  %355 = vmatpush.msra.mxu0 (%p271_p4), %v317_v18  ;;  %s415_s21 = scalar_lea.sflag (%p271_p4), [#allocation5], %s835_s29  ;;  %s650_s11 = sshra.s32 (%p271_p4), %s428_s10, 4  ;;  %s651_s11 = int_to_ptr.hbm [resolvable:$true] %s650_s11 }
  0x2d   : >> { %v287_v4 = vld [vmem:[#allocation2 + $0x8] sm:$0xff]  ;;  %v282_v7 = vld [vmem:[%s279_s30 + $0x20] sm:$0xff]  ;;  %v288_v8 = vadd.f32 %v284_v1, %v280_v5  ;;  %v327_v26 = vadd.s32 (%p271_p4), 4294967288, %v325_v24  ;;  %v335_v27 = vadd.s32 (%p271_p4), 4294967272, %v325_v24  ;;  %v331_v28 = vadd.s32 (%p271_p4), 4294967280, %v325_v24  ;;  %s652_s12 = scalar_lea.hbm (%p271_p4), %s651_s11, 1  ;;  %p657_p8 = scmp.lt.s32.totalorder (%p271_p4), %s651_s11, %s915_s5 }
  0x2e   : >> { %v290_v10 = vadd.f32 %v286_v3, %v282_v7  ;;  %v291_v12 = vadd.f32 %v287_v4, %v283_v11  ;;  %293 = vst [vmem:[#allocation2] sm:$0xff] %v289_v9  ;;  %356 = vmatpush.msra.mxu0 (%p271_p4), %v316_v19  ;;  %v363_v41 = vld [vmem:[%s913_s3] sm:$0x3] (%p271_p4)  ;;  %p653_p5 = scmp.ne.s32.totalorder (%p271_p4), %s651_s11, %s652_s12  ;;  %s656_s14 = scalar_lea.hbm (%p271_p4), %s915_s5, 2 }
  0x2f   : >> { %292 = vst [vmem:[#allocation2 + $0x10] sm:$0xff] %v288_v8  ;;  %273 = sbr.rel (!%p271_p4) target bundleno = 39 (0x27), region = 101  ;;  %523 = vmatpush.msk.msra.mxu1 (%p271_p4), %vm369_vm4, %v363_v41  ;;  %v319_v42 = vld [vmem:[%s912_s2] sm:$0x1] (%p271_p4)  ;;  %p658_p10 = scmp.lt.s32.totalorder (%p271_p4), %s656_s14, %s652_s12 }
  0x30   : >> { %294 = vst [vmem:[#allocation2 + $0x18] sm:$0xff] %v290_v10  ;;  %357 = vmatpush.msra.mxu0 (%p271_p4), %v315_v20  ;;  %v364_v46 = vld [vmem:[%s914_s4] sm:$0x1] (%p271_p4)  ;;  %p654_p6 = pnand (%p271_p4), %p653_p5, %p812_p9 }
  0x31   : >> { %295 = vst [vmem:[#allocation2 + $0x8] sm:$0xff] %v291_v12  ;;  %p659_p13 = por (%p271_p4), %p658_p10, %p657_p8 }
  0x32   : > { %p655_p7 = pneg (%p271_p4), %p654_p6 }
  0x34   : > { %p660_p0 = pnand %p659_p13, %p655_p7 }
  0x35   : > { %v300_v15 = vld [vmem:[#allocation2] sm:$0xff] }
  0x36   : > { %v299_v13 = vld [vmem:[#allocation2 + $0x10] sm:$0xff] }
  0x37   : > { %v301_v14 = vld [vmem:[#allocation2 + $0x18] sm:$0xff]  ;;  %303 = vadd.xlane.f32.xlu0 %v299_v13 }
  0x38   : > { %307 = vadd.xlane.f32.xlu1 %v301_v14  ;;  %v302_v16 = vld [vmem:[#allocation2 + $0x8] sm:$0xff] }
  0x3f   : > { %305 = vadd.xlane.f32.xlu0 %v300_v15 }
  0x40   : > { %309 = vadd.xlane.f32.xlu1 %v302_v16 }
  0xaa   : > { %v304_v22 = vpop.xlane.xlu0 %303 }
  0xab   : > { %v308_v23 = vpop.xlane.xlu1 %307  ;;  %v311_v25 = vmul.f32 0.00390625, %v304_v22 }
  0xac   : > { %v313_v29 = vmul.f32 0.00390625, %v308_v23 }
  0xad   : > { %v326_v34 = vperm.slane %v311_v25, %v325_v24 }
  0xae   : > { %v332_v37 = vperm.slane %v313_v29, %v331_v28 }
  0xb2   : > { %v306_v30 = vpop.xlane.xlu0 %305 }
  0xb3   : > { %v310_v31 = vpop.xlane.xlu1 %309  ;;  %v312_v32 = vmul.f32 0.00390625, %v306_v30 }
  0xb4   : > { %v314_v33 = vmul.f32 0.00390625, %v310_v31 }
  0xb5   : > { %v328_v35 = vperm.slane %v312_v32, %v327_v26 }
  0xb6   : > { %v336_v36 = vperm.slane %v314_v33, %v335_v27 }
  0xb7   : > { %v330_v38 = vsel %vm329_vm0, %v328_v35, %v326_v34 }
  0xb8   : > { %v334_v39 = vsel %vm333_vm1, %v332_v37, %v330_v38 }
  0xb9   : > { %v338_v40 = vsel %vm337_vm2, %v336_v36, %v334_v39 }
  0xba   : > { %522 = vmatmul.msk.f32.vlgmr.msra.gmra.mxu0 %vm339_vm3, %v338_v40 }
 0x137   : > { %v359_v43 = vpop.f32.mrf.mxu0 }
 0x138   : > { %v360_v44 = vadd.f32 %v359_v43, %v319_v42 }
 0x13a   : > { %v362_v45 = vmax.f32 %v360_v44, 0.0 }
 0x13c   : > { %524 = vmatmul.msk.f32.vlgmr.msra.gmra.mxu1 %vm365_vm5, %v362_v45 }
 0x1b9   : > { %v390_v47 = vpop.f32.mrf.mxu1 }
 0x1ba   : > { %v391_v48 = vadd.f32 %v390_v47, %v364_v46 }
 0x1bc   : > { %v525_v49 = vmul.f32 -1.442695, %v391_v48 }
 0x1be   : > { %602 = vpow2.f32 %v525_v49 }
 0x1c4   : > { %v603_v50 = vpop.eup %602 }
 0x1c5   : > { %v396_v51 = vadd.f32 1.0, %v603_v50 }
 0x1c7   : > { %604 = vrcp.f32 %v396_v51  ;;  %v408_v55 = vand.u32 2147483648, %v396_v51  ;;  %v406_v57 = vand.u32 2147483647, %v396_v51  ;;  %vm402_vm7 = vweird.f32 %v396_v51 }
 0x1c9   : > { %v409_v59 = vor.u32 1.1754944e-38, %v408_v55  ;;  %vm407_vm10 = vcmp.eq.f32.partialorder %v406_v57, 8.507059e+37 }
 0x1cd   : > { %v605_v52 = vpop.eup %604 }
 0x1ce   : > { %v398_v53 = vmul.f32 %v605_v52, %v396_v51  ;;  %vm403_vm6 = vweird.f32 %v605_v52 }
 0x1cf   : > { %vm404_vm8 = vmor %vm402_vm7, %vm403_vm6 }
 0x1d0   : > { %v399_v54 = vsub.f32 1.0, %v398_v53 }
 0x1d2   : > { %v400_v56 = vmul.f32 %v605_v52, %v399_v54 }
 0x1d4   : > { %v401_v58 = vadd.f32 %v605_v52, %v400_v56 }
 0x1d6   : > { %v405_v60 = vsel %vm404_vm8, %v605_v52, %v401_v58 }
 0x1d7   : > { %v410_v61 = vsel %vm407_vm10, %v409_v59, %v405_v60 }
 0x1d8   : > { %413 = vst.msk [vmem:[%s259_s28] sm:$0x1] %vm412_vm9, %v410_v61 }
 0x1d9   : > { %663 = shalt.err (!%p660_p0)
}
 0x1da   : > { %531 = dma.vmem_to_hbm [thread:$0]  (%p812_p9), %s426_s27, 16, %s428_s10, %s415_s21  }
 0x1db PF: > { %s439_s29 = sand.u32 1, %s702_s18   ;;  %p538_p1 = pnand %p514_p12, %p819_p11 }
 0x1dc   : > { %s440_s28 = scalar_lea.sflag [#allocation5], %s439_s29 }
 0x1dd   : > { %p539_p2 = pneg %p538_p1 }
 0x1df   : > { %697 = dma.done.wait (%p539_p2), %s440_s28, 16  }
 0x1e0   : > { %699 = vsyncadd (%p539_p2), %s440_s28, 4294967280  ;;  %s21_s23 = sadd.s32 1, %s722_s23   ;;  %s920_s18 = smov %s706_s19 }
 0x1e1   : > { %p18_p3 = scmp.ge.s32.totalorder %s21_s23, 4   ;;  %s921_s19 = smov %s710_s20 }
 0x1e2   : > { %s922_s20 = smov %s817_s7  ;;  %s923_s21 = smov %s718_s22 }
 0x1e3   : > { %s924_s22 = smov %s926_s26  ;;  %20 = sbr.rel (!%p18_p3) target bundleno = 6 (0x6), region = 112 }
 0x1e8   :  { %445 = vsyncpa [#allocation4], 1 }
 0x1e9   :  { %447 = vsyncpa [#allocation4 + $0x1], 1 }
 0x1ea   :  { %448 = vsyncpa [#allocation5], 1 }
 0x1eb   :  { %450 = vsyncpa [#allocation5 + $0x1], 1 }

</bundles_post_ra>
